<compile_context>
chip_gen: v5e
topology: v5e:2x2
jax: 0.10.0
libtpu: 0.0.40
codegen_flags: <defaults>
</compile_context>

<pallas_src>
import math

import numpy as np
import jax
import jax.numpy as jnp
from jax.experimental import pallas as pl
from jax.experimental.pallas import tpu as pltpu

P_STAR = 5            # len(a) - 1, where a = [3, -7, 11, -7, -4, 7]
LANES = 1024          # preferred lane-dense last dim (multiple of 128)
MAX_BLOCK_ROWS = 512  # 512 x 1024 f32 = 2 MiB per block (v5e-safe footprint)
E_CLAMP = 1e8         # keeps the cubic denominator finite in f32

# c_k = 2*k*exp(k), so  2*k*exp(-(x - k + 3)) == c_k * exp(-(x + 3)).
_C = tuple(2.0 * k * math.exp(k) for k in range(P_STAR + 1))

# Denominator polynomial coefficients (theta-independent Python constants).
# D_A(e) = (1+c1 e)(1+c2 e)(1+c3 e),  D_B(e) = (1+c4 e)(1+c5 e)
_DA1 = _C[1] + _C[2] + _C[3]
_DA2 = _C[1] * _C[2] + _C[1] * _C[3] + _C[2] * _C[3]
_DA3 = _C[1] * _C[2] * _C[3]
_DB1 = _C[4] + _C[5]
_DB2 = _C[4] * _C[5]


def _recip(d):
    # Approx EUP reciprocal + one Newton step: ~2^-24 relative error,
    # cheaper than the exact-divide lowering (FMAs go to the 4-wide VALU).
    r = pl.reciprocal(d, approx=True)
    return r * (2.0 - d * r)


def predictor_kernel(coef_ref, x_ref, out_ref):
    # coef_ref: SMEM f32[6] = [theta0, na0, na1, na2, nb0, nb1]
    # x_ref / out_ref: VMEM f32[tile_m, cols]
    x = x_ref[...]
    e = jnp.exp(-(x + 3.0))          # single transcendental per element (EUP)
    e = jnp.minimum(e, E_CLAMP)      # overflow guard for the cubic denominator
    # Grouped rational terms (Horner form, all-positive denominators >= 1).
    num_a = (coef_ref[3] * e + coef_ref[2]) * e + coef_ref[1]
    den_a = ((_DA3 * e + _DA2) * e + _DA1) * e + 1.0
    num_b = coef_ref[5] * e + coef_ref[4]
    den_b = (_DB2 * e + _DB1) * e + 1.0
    # k = 0 term is exactly theta[0] (2*k == 0).
    out_ref[...] = coef_ref[0] + num_a * _recip(den_a) + num_b * _recip(den_b)


def _group_coeffs(theta):
    """Theta-dependent numerator coefficients of the grouped rational form."""
    t = jnp.asarray(theta, jnp.float32)
    t0, t1, t2, t3, t4, t5 = (t[i] for i in range(P_STAR + 1))
    na0 = t1 + t2 + t3
    na1 = t1 * (_C[2] + _C[3]) + t2 * (_C[1] + _C[3]) + t3 * (_C[1] + _C[2])
    na2 = t1 * (_C[2] * _C[3]) + t2 * (_C[1] * _C[3]) + t3 * (_C[1] * _C[2])
    nb0 = t4 + t5
    nb1 = t4 * _C[5] + t5 * _C[4]
    return jnp.stack([t0, na0, na1, na2, nb0, nb1]).astype(jnp.float32)


def _pick_cols(n):
    """Widest lane-dense column count that needs no padding and gives >=16 rows."""
    for cols in (1024, 512, 256, 128):
        if n % cols == 0 and n // cols >= 16:
            return cols, True
    for cols in (1024, 512, 256, 128):
        if n % cols == 0:
            return cols, True
    return LANES, False  # ragged: tail padding fallback


def _choose_tile_rows(rows):
    """Tile rows: multiple of 8, <= MAX_BLOCK_ROWS, >= 4 even grid steps when possible."""
    if rows < 16:
        return rows  # single block equal to the full dim (tiny input)
    steps = max(4, -(-rows // MAX_BLOCK_ROWS))
    steps += steps % 2                  # even step count for v7x's two TensorCores
    tile = -(-rows // steps)
    tile = ((tile + 7) // 8) * 8        # multiple of 8 sublanes
    return max(8, min(tile, MAX_BLOCK_ROWS))


def _predictor_2d(x2d, coeffs, tile_m):
    M, N = x2d.shape
    return pl.pallas_call(
        predictor_kernel,
        out_shape=jax.ShapeDtypeStruct((M, N), jnp.float32),
        grid=(pl.cdiv(M, tile_m),),     # ragged last block is masked by Pallas
        in_specs=[
            pl.BlockSpec(memory_space=pltpu.MemorySpace.SMEM),  # grouped coeffs
            pl.BlockSpec((tile_m, N), lambda i: (i, 0)),
        ],
        out_specs=pl.BlockSpec((tile_m, N), lambda i: (i, 0)),
        compiler_params=pltpu.CompilerParams(
            dimension_semantics=("parallel",)  # shard grid steps across TCs (v7x)
        ),
    )(coeffs, x2d)


def predictor(x, theta):
    """Elementwise Predictor.forward for arbitrary-shaped x (computed in f32)."""
    orig_shape = x.shape
    coeffs = _group_coeffs(theta)
    xf = jnp.ravel(x).astype(jnp.float32)
    n = xf.size
    if n == 0:
        return jnp.zeros(orig_shape, jnp.float32)

    cols, aligned = _pick_cols(n)
    if aligned:
        rows = n // cols
        x2d = xf.reshape(rows, cols)                       # pure relayout, no copy
        out2d = _predictor_2d(x2d, coeffs, _choose_tile_rows(rows))
        return out2d.reshape(orig_shape)                   # no prefix-slice copy

    # Fallback for n not a multiple of 128: pad only the <=1023-element tail
    # (costs one extra HBM pass for the pad and one for the prefix slice).
    rows = -(-n // cols)
    pad = rows * cols - n
    x2d = jnp.pad(xf, (0, pad)).reshape(rows, cols)
    out2d = _predictor_2d(x2d, coeffs, _choose_tile_rows(rows))
    return out2d.reshape(-1)[:n].reshape(orig_shape)


def predictor_ref(x, theta):
    """Pure-JAX reference mirroring the PyTorch forward term-by-term (no factoring)."""
    result = jnp.zeros_like(x)
    for k in range(P_STAR + 1):
        result = result + theta[k] / (1.0 + 2.0 * k * jnp.exp(-(x - k + 3.0)))
    return result


if __name__ == "__main__":
    key = jax.random.PRNGKey(0)
    k_theta, k_x = jax.random.split(key)

    # Deterministic stand-in for np.random.uniform(-100, 100, size=p_star + 1)
    theta = jax.random.uniform(
        k_theta, (P_STAR + 1,), dtype=jnp.float32, minval=-100.0, maxval=100.0
    )

    # Small arbitrary-shaped input (op is elementwise); exercises the copy-free path.
    x = jax.random.normal(k_x, (2, 4, 16, 16), dtype=jnp.float32)

    out = jax.block_until_ready(predictor(x, theta))
    assert out.shape == x.shape

    ref = predictor_ref(x, theta)
    # f32 compute, grouped-rational rewrite + Newton-refined reciprocals:
    # stays within ~1e-4 relative / 1e-3 absolute of the unfactored reference.
    np.testing.assert_allclose(np.asarray(out), np.asarray(ref), rtol=1e-4, atol=1e-3)

    print("KERNEL_OK")
</pallas_src>

<mosaic_0001>
module attributes {stable_mosaic.version = 11 : i64} {
  func.func @predictor_kernel(%arg0: i32, %arg1: memref<6xf32, #tpu.memory_space<smem>>, %arg2: memref<8x128xf32, #tpu.memory_space<vmem>>, %arg3: memref<8x128xf32, #tpu.memory_space<vmem>>) attributes {dimension_semantics = [#tpu.dimension_semantics<parallel>], iteration_bounds = array<i64: 2>, scalar_prefetch = 0 : i64, scratch_operands = 0 : i64, tpu.core_type = #tpu.core_type<tc>, window_params = [{transform_indices = @transform_0, window_bounds = array<i64: 6>}, {transform_indices = @transform_1, window_bounds = array<i64: 8, 128>}, {transform_indices = @transform_2, window_bounds = array<i64: 8, 128>}]} {
    %c0 = arith.constant 0 : index
    %c0_0 = arith.constant 0 : index
    %0 = vector.load %arg2[%c0, %c0_0] : memref<8x128xf32, #tpu.memory_space<vmem>>, vector<8x128xf32>
    %cst = arith.constant 3.000000e+00 : f32
    %1 = vector.broadcast %cst : f32 to vector<8x128xf32>
    %2 = arith.addf %0, %1 : vector<8x128xf32>
    %cst_1 = arith.constant 0.000000e+00 : f32
    %3 = vector.broadcast %cst_1 : f32 to vector<8x128xf32>
    %4 = arith.subf %3, %2 : vector<8x128xf32>
    %5 = math.exp %4 : vector<8x128xf32>
    %cst_2 = arith.constant 1.000000e+08 : f32
    %6 = vector.broadcast %cst_2 : f32 to vector<8x128xf32>
    %7 = arith.minimumf %5, %6 : vector<8x128xf32>
    %c3 = arith.constant 3 : index
    %8 = memref.load %arg1[%c3] : memref<6xf32, #tpu.memory_space<smem>>
    %9 = vector.broadcast %8 : f32 to vector<8x128xf32>
    %10 = arith.mulf %9, %7 : vector<8x128xf32>
    %c2 = arith.constant 2 : index
    %11 = memref.load %arg1[%c2] : memref<6xf32, #tpu.memory_space<smem>>
    %12 = vector.broadcast %11 : f32 to vector<8x128xf32>
    %13 = arith.addf %10, %12 : vector<8x128xf32>
    %14 = arith.mulf %13, %7 : vector<8x128xf32>
    %c1 = arith.constant 1 : index
    %15 = memref.load %arg1[%c1] : memref<6xf32, #tpu.memory_space<smem>>
    %16 = vector.broadcast %15 : f32 to vector<8x128xf32>
    %17 = arith.addf %14, %16 : vector<8x128xf32>
    %cst_3 = arith.constant 19364.582 : f32
    %18 = vector.broadcast %cst_3 : f32 to vector<8x128xf32>
    %19 = arith.mulf %18, %7 : vector<8x128xf32>
    %cst_4 = arith.constant 4377.77783 : f32
    %20 = vector.broadcast %cst_4 : f32 to vector<8x128xf32>
    %21 = arith.addf %19, %20 : vector<8x128xf32>
    %22 = arith.mulf %21, %7 : vector<8x128xf32>
    %cst_5 = arith.constant 155.506012 : f32
    %23 = vector.broadcast %cst_5 : f32 to vector<8x128xf32>
    %24 = arith.addf %22, %23 : vector<8x128xf32>
    %25 = arith.mulf %24, %7 : vector<8x128xf32>
    %cst_6 = arith.constant 1.000000e+00 : f32
    %26 = vector.broadcast %cst_6 : f32 to vector<8x128xf32>
    %27 = arith.addf %25, %26 : vector<8x128xf32>
    %c5 = arith.constant 5 : index
    %28 = memref.load %arg1[%c5] : memref<6xf32, #tpu.memory_space<smem>>
    %29 = vector.broadcast %28 : f32 to vector<8x128xf32>
    %30 = arith.mulf %29, %7 : vector<8x128xf32>
    %c4 = arith.constant 4 : index
    %31 = memref.load %arg1[%c4] : memref<6xf32, #tpu.memory_space<smem>>
    %32 = vector.broadcast %31 : f32 to vector<8x128xf32>
    %33 = arith.addf %30, %32 : vector<8x128xf32>
    %cst_7 = arith.constant 648246.688 : f32
    %34 = vector.broadcast %cst_7 : f32 to vector<8x128xf32>
    %35 = arith.mulf %34, %7 : vector<8x128xf32>
    %cst_8 = arith.constant 1920.91675 : f32
    %36 = vector.broadcast %cst_8 : f32 to vector<8x128xf32>
    %37 = arith.addf %35, %36 : vector<8x128xf32>
    %38 = arith.mulf %37, %7 : vector<8x128xf32>
    %cst_9 = arith.constant 1.000000e+00 : f32
    %39 = vector.broadcast %cst_9 : f32 to vector<8x128xf32>
    %40 = arith.addf %38, %39 : vector<8x128xf32>
    %c0_10 = arith.constant 0 : index
    %41 = memref.load %arg1[%c0_10] : memref<6xf32, #tpu.memory_space<smem>>
    %42 = tpu.reciprocal %27 {approx = true} : vector<8x128xf32> -> vector<8x128xf32>
    %43 = arith.mulf %27, %42 : vector<8x128xf32>
    %cst_11 = arith.constant 2.000000e+00 : f32
    %44 = vector.broadcast %cst_11 : f32 to vector<8x128xf32>
    %45 = arith.subf %44, %43 : vector<8x128xf32>
    %46 = arith.mulf %42, %45 : vector<8x128xf32>
    %47 = arith.mulf %17, %46 : vector<8x128xf32>
    %48 = vector.broadcast %41 : f32 to vector<8x128xf32>
    %49 = arith.addf %48, %47 : vector<8x128xf32>
    %50 = tpu.reciprocal %40 {approx = true} : vector<8x128xf32> -> vector<8x128xf32>
    %51 = arith.mulf %40, %50 : vector<8x128xf32>
    %cst_12 = arith.constant 2.000000e+00 : f32
    %52 = vector.broadcast %cst_12 : f32 to vector<8x128xf32>
    %53 = arith.subf %52, %51 : vector<8x128xf32>
    %54 = arith.mulf %50, %53 : vector<8x128xf32>
    %55 = arith.mulf %33, %54 : vector<8x128xf32>
    %56 = arith.addf %49, %55 : vector<8x128xf32>
    %c0_13 = arith.constant 0 : index
    %c0_14 = arith.constant 0 : index
    %57 = vector.load %arg3[%c0_13, %c0_14] : memref<8x128xf32, #tpu.memory_space<vmem>>, vector<8x128xf32>
    tpu.vector_store %arg3[%c0_13, %c0_14], %56 {strides = array<i32>} : memref<8x128xf32, #tpu.memory_space<vmem>>, vector<8x128xf32>,
    return
  }
  func.func @transform_0(%arg0: i32) -> i32 {
    %c0_i32 = arith.constant 0 : i32
    %c0_i32_0 = arith.constant 0 : i32
    return %c0_i32 : i32
  }
  func.func @transform_1(%arg0: i32) -> (i32, i32) {
    %c0_i32 = arith.constant 0 : i32
    %c0_i32_0 = arith.constant 0 : i32
    return %arg0, %c0_i32 : i32, i32
  }
  func.func @transform_2(%arg0: i32) -> (i32, i32) {
    %c0_i32 = arith.constant 0 : i32
    %c0_i32_0 = arith.constant 0 : i32
    return %arg0, %c0_i32 : i32, i32
  }
}

</mosaic_0001>

<bundles_post_ra>
// kernel: tpu_custom_call.1
= control target key start
LH: loop header
LB: loop body
LE: loop exit
PB: predicated region body
PF: predicated region fallthrough
CT: control target
= control target key end

     0   :  { %7 = vsyncpa [#allocation5], 0  ;;  %s677_s0 = inlined_call_operand.hbm [shape: f32[6], index: 0, kind: input, shape index: {}]   ;;  %s678_s1 = inlined_call_operand.hbm [shape: f32[16,128], index: 1, kind: input, shape index: {}]   ;;  %s679_s2 = inlined_call_operand.hbm [shape: f32[16,128], index: 2, kind: output, shape index: {}]  }
   0x1   :  { %8 = vsyncpa [#allocation3], 0 }
   0x2   :  { %10 = vsyncpa [#allocation3 + $0x1], 0 }
   0x3   :  { %11 = vsyncpa [#allocation4], 0 }
   0x4   :  { %13 = vsyncpa [#allocation4 + $0x1], 0  ;;  %s535_s9 = smov 0   ;;  %s537_s10 = smov 0  }
   0x5   :  { %s539_s11 = smov 0   ;;  %s541_s12 = smov 0  }
   0x6 LB: > { %s556_s13 = sadd.s32 4294967295, %s517_s12   ;;  %s320_s14 = sadd.s32 4294967294, %s517_s12   ;;  %s517_s12 = sphi %s541_s12, %s689_s12   ;;  %s513_s11 = sphi %s539_s11, %s688_s11   ;;  %s509_s10 = sphi %s537_s10, %s687_s10   ;;  %s505_s9 = sphi %s535_s9, %s686_s9  }
   0x7   : > { %p60_p0 = scmp.ne.s32.totalorder %s509_s10, %s505_s9  ;;  %p61_p1 = scmp.eq.s32.totalorder %s556_s13, 0 }
   0x8   : > { %p84_p2 = scmp.eq.s32.totalorder %s556_s13, 1  ;;  %p90_p3 = scmp.eq.s32.totalorder %s320_s14, 1 }
   0x9   : > { %p565_p4 = por %p61_p1, %p60_p0  ;;  %p321_p5 = scmp.ge.s32.totalorder %s517_s12, 1 }
   0xa   : > { %p570_p6 = por %p90_p3, %p60_p0  ;;  %p97_p7 = scmp.lt.s32.totalorder %s517_s12, 3 }
   0xb   : > { %s109_s19 = sshll.u32 %s677_s0, 4  ;;  %s586_s21 = sadd.s32 1, %s517_s12   ;;  %s110_s19 = int_to_ptr.hbm [resolvable:$true] %s109_s19 }
   0xc   : > { %p578_p8 = pnand %p321_p5, %p97_p7  ;;  %s44_s22 = ssub.s32 %s517_s12, %s586_s21 }
   0xd   : > { %p45_p12 = scmp.eq.s32.totalorder %s44_s22, 0  ;;  %s47_s23 = sadd.s32 1, %s513_s11 }
   0xe   : > { %p347_p10 = pneg %p578_p8  ;;  %p54_p13 = scmp.ne.s32.totalorder %s513_s11, %s509_s10 }
   0xf   : > { %s519_s24 = smov [#allocation2]   ;;  %p55_p0 = scmp.eq.s32.totalorder %s517_s12, 0 }
  0x10   : > { %p348_p11 = pnand %p347_p10, %p61_p1  ;;  %p601_p3 = por %p84_p2, %p54_p13 }
  0x11   : > { %s596_s25 = scalar_select %p45_p12, %s513_s11, %s47_s23  }
  0x12   : > { %350 = dma.hbm_to_smem (!%p348_p11), %s110_s19, 16, %s519_s24, [#allocation5]  }
  0x13   : > { %s120_s27 = sand.u32 1, %s513_s11   ;;  %p56_p5 = por %p55_p0, %p54_p13 }
  0x14   : > { %p360_p7 = scmp.lt.s32.totalorder %s517_s12, 2  ;;  %s324_s28 = sshll.u32 %s120_s27, 3 }
  0x15   : > { %s325_s29 = sshll.u32 %s517_s12, 3  ;;  %s124_s6 = scalar_lea.vmem [#allocation6], %s324_s28 }
  0x16   : > { %s128_s4 = scalar_lea.hbm %s678_s1, %s325_s29  ;;  %s132_s7 = sshll.u32 %s124_s6, 4  ;;  %s133_s7 = int_to_ptr.vmem [resolvable:$true] %s132_s7 }
  0x17   : > { %s130_s5 = sshll.u32 %s128_s4, 4  ;;  %p611_p10 = pnand %p360_p7, %p56_p5  ;;  %s131_s5 = int_to_ptr.hbm [resolvable:$true] %s130_s5 }
  0x18   : > { %s121_s14 = scalar_lea.sflag [#allocation3], %s120_s27  ;;  %s417_s17 = sshra.s32 %s131_s5, 4  ;;  %s418_s17 = int_to_ptr.hbm [resolvable:$true] %s417_s17 }
  0x19   : > { %s419_s18 = scalar_lea.hbm %s418_s17, 8  ;;  %p421_p11 = pneg %p611_p10 }
  0x1a   : > { %p420_p2 = scmp.ne.s32.totalorder %s418_s17, %s419_s18  ;;  %s424_s23 = scalar_lea.hbm %s678_s1, 16 }
  0x1b   : > { %p425_p0 = scmp.lt.s32.totalorder %s418_s17, %s678_s1  ;;  %p426_p5 = scmp.lt.s32.totalorder %s424_s23, %s419_s18 }
  0x1c   : > { %p422_p12 = pnand %p421_p11, %p420_p2 }
  0x1d   : > { %p427_p7 = por %p426_p5, %p425_p0 }
  0x1e   : > { %p423_p13 = pneg %p422_p12 }
  0x20   : > { %p428_p9 = pnand %p427_p7, %p423_p13 }
  0x22   : > { %431 = shalt.err (!%p428_p9)
}
  0x23   : > { %354 = dma.hbm_to_vmem [thread:$0]  (!%p611_p10), %s131_s5, 128, %s133_s7, %s121_s14  }
  0x24   : > { %141 = sbr.rel (%p578_p8) target bundleno = 98 (0x62), region = 28 }
  0x29   : > { %492 = dma.done.wait (%p61_p1), [#allocation5], 16  }
  0x2a   : > { %494 = vsyncadd (%p61_p1), [#allocation5], 4294967280  ;;  %s632_s27 = sand.u32 1, %s509_s10  }
  0x2b   : > { %s328_s29 = sshll.u32 %s632_s27, 3  ;;  %s149_s30 = scalar_lea.sflag [#allocation3], %s632_s27 }
  0x2c   : > { %s152_s3 = scalar_lea.vmem [#allocation6], %s328_s29 }
  0x2d   : > { %496 = dma.done.wait (%p565_p4), %s149_s30, 128  }
  0x2e   : > { %498 = vsyncadd (%p565_p4), %s149_s30, 4294967168 }
  0x2f   : > { %158 = sfence }
  0x30   : > { %v175_v0 = vld [vmem:[%s152_s3] sm:$0xff]  ;;  %s330_s20 = sld [smem:[#allocation2 + $0x3]]  ;;  %s336_s8 = sshll.u32 %s556_s13, 3 }
  0x31   : > { %v176_v1 = vadd.f32 3.0, %v175_v0  ;;  %s331_s4 = sld [smem:[#allocation2 + $0x2]]  ;;  %s233_s18 = scalar_lea.hbm %s679_s2, %s336_s8 }
  0x32   : > { %s333_s15 = sld [smem:[#allocation2 + $0x5]]  ;;  %s174_s19 = scalar_lea.vmem [#allocation7], %s328_s29 }
  0x33   : > { %v177_v2 = vsub.f32 0.0, %v176_v1  ;;  %s332_s5 = sld [smem:[#allocation2 + $0x1]]  ;;  %s235_s22 = sshll.u32 %s174_s19, 4  ;;  %s236_s22 = int_to_ptr.vmem [resolvable:$true] %s235_s22 }
  0x34   : > { %s334_s6 = sld [smem:[#allocation2 + $0x4]]  ;;  %s237_s23 = sshll.u32 %s233_s18, 4  ;;  %s238_s23 = int_to_ptr.hbm [resolvable:$true] %s237_s23 }
  0x35   : > { %v178_v3 = vmul.f32 1.442695, %v177_v2  ;;  %s207_s7 = sld [smem:[#allocation2]]  ;;  %s223_s13 = scalar_lea.sflag [#allocation4], %s632_s27 }
  0x36   : > { %v182_v12 = vstv %s330_s20  ;;  %s461_s24 = sshra.s32 %s238_s23, 4  ;;  %s467_s20 = scalar_lea.hbm %s679_s2, 16  ;;  %s462_s24 = int_to_ptr.hbm [resolvable:$true] %s461_s24 }
  0x37   : > { %396 = vpow2.f32 %v178_v3  ;;  %v185_v17 = vstv %s331_s4  ;;  %s463_s28 = scalar_lea.hbm %s462_s24, 8  ;;  %p468_p9 = scmp.lt.s32.totalorder %s462_s24, %s679_s2 }
  0x38   : > { %v198_v21 = vstv %s333_s15  ;;  %p464_p1 = scmp.ne.s32.totalorder %s462_s24, %s463_s28  ;;  %p469_p10 = scmp.lt.s32.totalorder %s467_s20, %s463_s28 }
  0x39   : > { %v189_v27 = vstv %s332_s5 }
  0x3a   : > { %v201_v28 = vstv %s334_s6  ;;  %p465_p4 = pnand %p464_p1, %p601_p3  ;;  %p470_p2 = por %p469_p10, %p468_p9 }
  0x3b   : > { %v213_v35 = vstv %s207_s7 }
  0x3c   : > { %p466_p8 = pneg %p465_p4 }
  0x3d   : > { %v397_v4 = vpop.eup %396 }
  0x3e   : > { %v180_v5 = vmin.f32 %v397_v4, 1e+08  ;;  %p471_p11 = pnand %p470_p2, %p466_p8 }
  0x40   : > { %v191_v6 = vmul.f32 19364.582, %v180_v5  ;;  %v203_v7 = vmul.f32 648246.7, %v180_v5  ;;  %v183_v16 = vmul.f32 %v182_v12, %v180_v5  ;;  %v199_v24 = vmul.f32 %v198_v21, %v180_v5 }
  0x42   : > { %v192_v8 = vadd.f32 4377.778, %v191_v6  ;;  %v204_v9 = vadd.f32 1920.9167, %v203_v7  ;;  %v186_v19 = vadd.f32 %v185_v17, %v183_v16  ;;  %v202_v31 = vadd.f32 %v201_v28, %v199_v24 }
  0x44   : > { %v193_v10 = vmul.f32 %v192_v8, %v180_v5  ;;  %v205_v11 = vmul.f32 %v204_v9, %v180_v5  ;;  %v187_v23 = vmul.f32 %v186_v19, %v180_v5 }
  0x46   : > { %v194_v13 = vadd.f32 155.50601, %v193_v10  ;;  %v206_v14 = vadd.f32 1.0, %v205_v11  ;;  %v190_v30 = vadd.f32 %v189_v27, %v187_v23 }
  0x48   : > { %v195_v15 = vmul.f32 %v194_v13, %v180_v5  ;;  %398 = vrcp.f32 %v206_v14 }
  0x4a   : > { %v196_v18 = vadd.f32 1.0, %v195_v15 }
  0x4c   : > { %400 = vrcp.f32 %v196_v18 }
  0x4e   : > { %v399_v20 = vpop.eup %398 }
  0x4f   : > { %v216_v22 = vmul.f32 %v399_v20, %v206_v14 }
  0x51   : > { %v217_v25 = vsub.f32 2.0, %v216_v22 }
  0x52   : > { %v401_v26 = vpop.eup %400 }
  0x53   : > { %v209_v29 = vmul.f32 %v401_v26, %v196_v18  ;;  %v218_v33 = vmul.f32 %v399_v20, %v217_v25 }
  0x55   : > { %v210_v32 = vsub.f32 2.0, %v209_v29  ;;  %v219_v37 = vmul.f32 %v218_v33, %v202_v31 }
  0x57   : > { %v211_v34 = vmul.f32 %v401_v26, %v210_v32 }
  0x59   : > { %v212_v36 = vmul.f32 %v211_v34, %v190_v30 }
  0x5b   : > { %v214_v38 = vadd.f32 %v213_v35, %v212_v36 }
  0x5d   : > { %v220_v39 = vadd.f32 %v219_v37, %v214_v38 }
  0x5f   : > { %221 = vst [vmem:[%s174_s19] sm:$0xff] %v220_v39 }
  0x60   : > { %474 = shalt.err (!%p471_p11)
}
  0x61   : > { %345 = dma.vmem_to_hbm [thread:$0]  (%p601_p3), %s236_s22, 128, %s238_s23, %s223_s13  }
  0x62 PF: > { %s249_s27 = sand.u32 1, %s505_s9   ;;  %p685_p12 = scmp.ge.s32.totalorder %s517_s12, 2 }
  0x63   : > { %s250_s15 = scalar_lea.sflag [#allocation4], %s249_s27 }
  0x64   : > { %p356_p13 = pnand %p685_p12, %p570_p6 }
  0x66   : > { %p357_p0 = pneg %p356_p13 }
  0x68   : > { %500 = dma.done.wait (%p357_p0), %s250_s15, 128  }
  0x69   : > { %502 = vsyncadd (%p357_p0), %s250_s15, 4294967168  ;;  %p16_p5 = scmp.ge.s32.totalorder %s586_s21, 4   ;;  %s686_s9 = smov %s509_s10 }
  0x6a   : > { %s687_s10 = smov %s513_s11  ;;  %s688_s11 = smov %s596_s25 }
  0x6b   : > { %s689_s12 = smov %s586_s21  ;;  %18 = sbr.rel (!%p16_p5) target bundleno = 6 (0x6), region = 78 }
  0x70   :  { %256 = vsyncpa [#allocation3], 1 }
  0x71   :  { %258 = vsyncpa [#allocation3 + $0x1], 1 }
  0x72   :  { %259 = vsyncpa [#allocation4], 1 }
  0x73   :  { %261 = vsyncpa [#allocation4 + $0x1], 1 }
  0x74   :  { %262 = vsyncpa [#allocation5], 1 }
  0x75   :  { %264 = vsyncpa [#allocation5 + $0x1], 1 }

</bundles_post_ra>
